<compile_context>
chip_gen: v7x
topology: tpu7x:2x2x1
jax: 0.10.0
libtpu: 0.0.40
codegen_flags: <defaults>
</compile_context>

<pallas_src>
import functools

import jax
import jax.numpy as jnp
from jax import lax
from jax.experimental import pallas as pl
from jax.experimental.pallas import tpu as pltpu

_LANES = 128
_SUBLANES = 8
_CHUNK_ROWS = 1024          # rows per unrolled in-kernel accumulation chunk


def _round_up(x, m):
    return ((x + m - 1) // m) * m


def _device_kind():
    try:
        return jax.devices()[0].device_kind.lower()
    except Exception:
        return ""


def _preferred_tile_rows():
    """Rows (of 128 f32 lanes) per grid step, chosen per chip.

    v7x: 8192 rows -> 4 MiB/input/buffer, 16 MiB double-buffered (< 32 MiB
    scoped default).  v5e/v6e: 4096 rows -> 2 MiB/input/buffer, 8 MiB total
    (< v5e's 16 MiB scoped default, well under v6e's 32 MiB).
    """
    return 8192 if "v7" in _device_kind() else 4096


def _num_core_splits():
    """2-way megacore split only on v7x (2 TensorCores/chip); 1 elsewhere."""
    return 2 if "v7" in _device_kind() else 1


def _accum_block(p_ref, t_ref, o_ref, row0, *, rows_valid, tile_rows,
                 chunk_rows, masked):
    """Folds this (tile_rows, 128) block's (p-t)^2 onto the (8, 128) accumulator."""
    n_chunks = tile_rows // chunk_rows
    for j in range(n_chunks):
        sl = pl.ds(j * chunk_rows, chunk_rows)
        d = p_ref[sl, :].astype(jnp.float32) - t_ref[sl, :].astype(jnp.float32)
        if masked:
            rid = (row0 + j * chunk_rows
                   + lax.broadcasted_iota(jnp.int32, (chunk_rows, 1), 0))
            d = jnp.where(rid < rows_valid, d, 0.0)   # mask BEFORE squaring
        sq = d * d
        o_ref[...] += sq.reshape(
            chunk_rows // _SUBLANES, _SUBLANES, _LANES).sum(axis=0)


def _mse_partial_kernel(p_ref, t_ref, o_ref, *, tile_rows, chunk_rows,
                        steps_per_core, rows_valid, may_need_mask):
    """Per-(sublane, lane) partial sums of (p - t)^2.

    o_ref is an (8, 128) f32 block resident across the inner ("arbitrary")
    grid axis, acting as this core-split's accumulator.
    """
    c = pl.program_id(0)   # core-split index             (parallel)
    i = pl.program_id(1)   # row-tile step for this core  (arbitrary)

    @pl.when(i == 0)
    def _():
        o_ref[...] = jnp.zeros_like(o_ref)

    # Global (unclamped) row offset of this tile; rows >= rows_valid are
    # ragged-block padding or duplicated clamped reads -> masked to 0.
    row0 = (c * steps_per_core + i) * tile_rows
    accum = functools.partial(
        _accum_block, p_ref, t_ref, o_ref, row0,
        rows_valid=rows_valid, tile_rows=tile_rows, chunk_rows=chunk_rows)

    if may_need_mask:
        interior = row0 + tile_rows <= rows_valid

        @pl.when(interior)
        def _():
            accum(masked=False)

        @pl.when(jnp.logical_not(interior))
        def _():
            accum(masked=True)
    else:
        accum(masked=False)


def _mse_loss_pallas(preds, targets, *, tile_rows=None):
    n = preds.size
    assert n % _LANES == 0, "pallas path requires n % 128 == 0"
    # Zero-copy views: reshape of a contiguous row-major array is free in XLA.
    p2 = preds.reshape(-1, _LANES)
    t2 = targets.reshape(-1, _LANES)
    rows = p2.shape[0]

    if tile_rows is None:
        tile_rows = min(_preferred_tile_rows(), _round_up(rows, _SUBLANES))
        if tile_rows > _CHUNK_ROWS:
            tile_rows = _round_up(tile_rows, _CHUNK_ROWS)
    assert tile_rows % _SUBLANES == 0
    chunk_rows = min(_CHUNK_ROWS, tile_rows)
    assert tile_rows % chunk_rows == 0

    num_blocks = pl.cdiv(rows, tile_rows)
    splits = min(_num_core_splits(), num_blocks)
    steps_per_core = pl.cdiv(num_blocks, splits)
    # Masked branch only emitted if some tile can actually be ragged/clamped.
    may_need_mask = (rows % tile_rows != 0) or (splits * steps_per_core != num_blocks)

    def in_index_map(c, i):
        # Clamp overhang steps onto the last valid block; their contribution
        # is zeroed by the in-kernel row mask (which uses the unclamped index).
        return (jnp.minimum(c * steps_per_core + i, num_blocks - 1), 0)

    kernel = functools.partial(
        _mse_partial_kernel,
        tile_rows=tile_rows,
        chunk_rows=chunk_rows,
        steps_per_core=steps_per_core,
        rows_valid=rows,
        may_need_mask=may_need_mask,
    )

    out_rows = splits * _SUBLANES
    itemsize = jnp.dtype(preds.dtype).itemsize
    partials = pl.pallas_call(
        kernel,
        out_shape=jax.ShapeDtypeStruct((out_rows, _LANES), jnp.float32),
        grid_spec=pltpu.PrefetchScalarGridSpec(
            num_scalar_prefetch=0,
            grid=(splits, steps_per_core),
            in_specs=[
                pl.BlockSpec((tile_rows, _LANES), in_index_map),
                pl.BlockSpec((tile_rows, _LANES), in_index_map),
            ],
            out_specs=pl.BlockSpec((_SUBLANES, _LANES), lambda c, i: (c, 0)),
        ),
        compiler_params=pltpu.CompilerParams(
            dimension_semantics=("parallel", "arbitrary"),
        ),
        cost_estimate=pl.CostEstimate(
            flops=3 * n,
            transcendentals=0,
            bytes_accessed=2 * n * itemsize + out_rows * _LANES * 4,
        ),
    )(p2, t2)

    # Final (tiny) cross-lane reduction + mean in plain JAX.
    return jnp.sum(partials) / n


def mse_loss(preds, targets, *, min_pallas_elements=1 << 17, tile_rows=None):
    """Equivalent of torch.nn.functional.mse_loss(preds, targets) (mean)."""
    assert preds.shape == targets.shape, "preds/targets shape mismatch"
    n = preds.size
    assert n > 0
    if n % _LANES != 0 or n < min_pallas_elements:
        # * n % 128 != 0: a (rows, 128) operand would require a padded/sliced
        #   full copy of both tensors (extra HBM read+write pass each); one
        #   fused XLA pass is cheaper, so fall back.
        # * tiny inputs: pallas_call fixed startup cost dwarfs data movement.
        return jnp.mean(jnp.square(preds.astype(jnp.float32)
                                   - targets.astype(jnp.float32)))
    return _mse_loss_pallas(preds, targets, tile_rows=tile_rows)


if __name__ == "__main__":
    key = jax.random.PRNGKey(0)
    kp, kt = jax.random.split(key)
    # Shapes consistent with a dense-head prediction map (NCHW).
    preds = jax.random.normal(kp, (2, 4, 16, 16), dtype=jnp.float32)
    targets = jax.random.normal(kt, (2, 4, 16, 16), dtype=jnp.float32)

    # Force the Pallas path so this exercises the kernel even at a tiny shape.
    loss = mse_loss(preds, targets, min_pallas_elements=0)
    jax.block_until_ready(loss)
    ref = jnp.mean((preds - targets) ** 2)
    assert jnp.allclose(loss, ref, rtol=1e-5, atol=1e-6), (loss, ref)

    # Extra small/fast checks:
    #   (3, 89, 128): rows=267 -> ragged row tile, exercises in-kernel mask.
    #   (2048, 128) + tile override 256: 8 row tiles -> exercises accumulation
    #       across the "arbitrary" axis (and the core split on v7x).
    #   (3, 5, 7, 11): n % 128 != 0 -> fused fallback path (no pad copy).
    checks = [((3, 89, 128), None), ((2048, 128), 256), ((3, 5, 7, 11), None)]
    for tag, (shape, tr) in enumerate(checks):
        k1, k2 = jax.random.split(jax.random.fold_in(key, tag))
        a = jax.random.normal(k1, shape, dtype=jnp.float32)
        b = jax.random.normal(k2, shape, dtype=jnp.float32)
        got = mse_loss(a, b, min_pallas_elements=0, tile_rows=tr)
        jax.block_until_ready(got)
        want = jnp.mean((a - b) ** 2)
        assert jnp.allclose(got, want, rtol=1e-4, atol=1e-6), (shape, got, want)

    print("KERNEL_OK")
</pallas_src>

<mosaic_0001>
module attributes {stable_mosaic.version = 11 : i64} {
  func.func @_mse_partial_kernel(%arg0: i32, %arg1: i32, %arg2: memref<16x128xf32, #tpu.memory_space<vmem>>, %arg3: memref<16x128xf32, #tpu.memory_space<vmem>>, %arg4: memref<8x128xf32, #tpu.memory_space<vmem>>) attributes {dimension_semantics = [#tpu.dimension_semantics<parallel>, #tpu.dimension_semantics<arbitrary>], iteration_bounds = array<i64: 1, 1>, scalar_prefetch = 0 : i64, scratch_operands = 0 : i64, tpu.core_type = #tpu.core_type<tc>, window_params = [{transform_indices = @transform_0, window_bounds = array<i64: 16, 128>}, {transform_indices = @transform_1, window_bounds = array<i64: 16, 128>}, {transform_indices = @transform_2, window_bounds = array<i64: 8, 128>}]} {
    %c0_i32 = arith.constant 0 : i32
    %0 = arith.cmpi eq, %arg1, %c0_i32 : i32
    %1 = arith.extui %0 : i1 to i32
    %c0_i32_0 = arith.constant 0 : i32
    %2 = arith.cmpi ne, %1, %c0_i32_0 : i32
    scf.if %2 {
      %cst_8 = arith.constant 0.000000e+00 : f32
      %12 = vector.broadcast %cst_8 : f32 to vector<8x128xf32>
      %c0_9 = arith.constant 0 : index
      %c0_10 = arith.constant 0 : index
      %13 = vector.load %arg4[%c0_9, %c0_10] : memref<8x128xf32, #tpu.memory_space<vmem>>, vector<8x128xf32>
      tpu.vector_store %arg4[%c0_9, %c0_10], %12 {strides = array<i32>} : memref<8x128xf32, #tpu.memory_space<vmem>>, vector<8x128xf32>,
    } else {
    }
    %c0 = arith.constant 0 : index
    %c0_1 = arith.constant 0 : index
    %3 = vector.load %arg2[%c0, %c0_1] : memref<16x128xf32, #tpu.memory_space<vmem>>, vector<16x128xf32>
    %c0_2 = arith.constant 0 : index
    %c0_3 = arith.constant 0 : index
    %4 = vector.load %arg3[%c0_2, %c0_3] : memref<16x128xf32, #tpu.memory_space<vmem>>, vector<16x128xf32>
    %5 = arith.subf %3, %4 : vector<16x128xf32>
    %6 = arith.mulf %5, %5 : vector<16x128xf32>
    %c0_4 = arith.constant 0 : index
    %c0_5 = arith.constant 0 : index
    %7 = vector.load %arg4[%c0_4, %c0_5] : memref<8x128xf32, #tpu.memory_space<vmem>>, vector<8x128xf32>
    %8 = vector.shape_cast %6 : vector<16x128xf32> to vector<2x8x128xf32>
    %cst = arith.constant dense<0.000000e+00> : vector<8x128xf32>
    %9 = vector.multi_reduction <add>, %8, %cst [0] : vector<2x8x128xf32> to vector<8x128xf32>
    %10 = arith.addf %7, %9 : vector<8x128xf32>
    %c0_6 = arith.constant 0 : index
    %c0_7 = arith.constant 0 : index
    %11 = vector.load %arg4[%c0_6, %c0_7] : memref<8x128xf32, #tpu.memory_space<vmem>>, vector<8x128xf32>
    tpu.vector_store %arg4[%c0_6, %c0_7], %10 {strides = array<i32>} : memref<8x128xf32, #tpu.memory_space<vmem>>, vector<8x128xf32>,
    return
  }
  func.func @transform_0(%arg0: i32, %arg1: i32) -> (i32, i32) {
    %c1_i32 = arith.constant 1 : i32
    %0 = arith.muli %arg0, %c1_i32 : i32
    %1 = arith.addi %0, %arg1 : i32
    %c0_i32 = arith.constant 0 : i32
    %2 = arith.minsi %1, %c0_i32 : i32
    %c0_i32_0 = arith.constant 0 : i32
    %c0_i32_1 = arith.constant 0 : i32
    return %2, %c0_i32_0 : i32, i32
  }
  func.func @transform_1(%arg0: i32, %arg1: i32) -> (i32, i32) {
    %c1_i32 = arith.constant 1 : i32
    %0 = arith.muli %arg0, %c1_i32 : i32
    %1 = arith.addi %0, %arg1 : i32
    %c0_i32 = arith.constant 0 : i32
    %2 = arith.minsi %1, %c0_i32 : i32
    %c0_i32_0 = arith.constant 0 : i32
    %c0_i32_1 = arith.constant 0 : i32
    return %2, %c0_i32_0 : i32, i32
  }
  func.func @transform_2(%arg0: i32, %arg1: i32) -> (i32, i32) {
    %c0_i32 = arith.constant 0 : i32
    %c0_i32_0 = arith.constant 0 : i32
    return %arg0, %c0_i32 : i32, i32
  }
}

</mosaic_0001>

<bundles_post_ra>
// kernel: tpu_custom_call.1
= control target key start
LH: loop header
LB: loop body
LE: loop exit
PB: predicated region body
PF: predicated region fallthrough
CT: control target
= control target key end

     0   :  { %7 = vsyncpa [#allocation3], 0  ;;  %s231_s0 = inlined_call_operand.hbm [shape: f32[16,128], index: 0, kind: input, shape index: {}]   ;;  %s232_s1 = inlined_call_operand.hbm [shape: f32[16,128], index: 1, kind: input, shape index: {}]   ;;  %s233_s2 = inlined_call_operand.hbm [shape: f32[8,128], index: 2, kind: output, shape index: {}]  }
   0x1   :  { %8 = vsyncpa [#allocation6], 0 }
   0x2   :  { %9 = vsyncpa [#allocation4], 0  ;;  %s175_s9 = smov [#allocation2]   ;;  %s103_s13 = scalar_lea.hbm %s231_s0, 256 }
   0x3   :  { %s21_s10 = sshll.u32 %s175_s9, 4  ;;  %p104_p0 = scmp.ne.s32.totalorder %s231_s0, %s103_s13  ;;  %s22_s10 = int_to_ptr.vmem [resolvable:$true] %s21_s10 }
   0x4   :  { %p107_p1 = scmp.lt.u32.totalorder %s103_s13, %s231_s0 }
   0x6   :  { %p109_p2 = pnand %p107_p1, %p104_p0 }
   0x8   :  { %112 = shalt.err (!%p109_p2)
}
   0x9   :  { %s113_s18 = scalar_lea.vmem %s22_s10, 256  ;;  %p118_p4 = scmp.lt.s32.totalorder %s22_s10, %s22_s10 }
   0xa   :  { %p114_p3 = scmp.ne.s32.totalorder %s22_s10, %s113_s18  ;;  %p119_p5 = scmp.lt.s32.totalorder %s113_s18, %s113_s18 }
   0xc   :  { %p120_p6 = por %p119_p5, %p118_p4 }
   0xe   :  { %p121_p7 = pnand %p120_p6, %p114_p3 }
  0x10   :  { %124 = shalt.err (!%p121_p7)
}
  0x11   :  { %s176_s19 = smov 128   ;;  %s177_s20 = smov 8  }
  0x12   :  { %27 = dma.hbm_to_vmem [thread:$0]  %s231_s0, 256, %s22_s10, [#allocation3], %s176_s19, %s176_s19, %s177_s20  }
  0x13   :  { %s178_s23 = smov [#allocation5]   ;;  %s125_s27 = scalar_lea.hbm %s232_s1, 256 }
  0x14   :  { %s39_s24 = sshll.u32 %s178_s23, 4  ;;  %p126_p8 = scmp.ne.s32.totalorder %s232_s1, %s125_s27  ;;  %s40_s24 = int_to_ptr.vmem [resolvable:$true] %s39_s24 }
  0x15   :  { %p129_p9 = scmp.lt.u32.totalorder %s125_s27, %s232_s1 }
  0x17   :  { %p131_p10 = pnand %p129_p9, %p126_p8 }
  0x19   :  { %134 = shalt.err (!%p131_p10)
}
  0x1a   :  { %s135_s4 = scalar_lea.vmem %s40_s24, 256  ;;  %p140_p12 = scmp.lt.s32.totalorder %s40_s24, %s40_s24 }
  0x1b   :  { %p136_p11 = scmp.ne.s32.totalorder %s40_s24, %s135_s4  ;;  %p141_p13 = scmp.lt.s32.totalorder %s135_s4, %s135_s4 }
  0x1d   :  { %p142_p0 = por %p141_p13, %p140_p12 }
  0x1f   :  { %p143_p1 = pnand %p142_p0, %p136_p11 }
  0x21   :  { %146 = shalt.err (!%p143_p1)
}
  0x22   :  { %45 = dma.hbm_to_vmem [thread:$0]  %s232_s1, 256, %s40_s24, [#allocation6], %s176_s19, %s176_s19, %s177_s20  }
  0x23   :  { %169 = dma.done.wait [#allocation3], 256  }
  0x24   :  { %170 = vsyncadd [#allocation3], 4294967040 }
  0x25   :  { %171 = dma.done.wait [#allocation6], 256  }
  0x26   :  { %172 = vsyncadd [#allocation6], 4294967040  ;;  %v65_v0 = vld [vmem:[#allocation2] sm:$0xff]  ;;  %v66_v1 = vld [vmem:[#allocation2 + $0x8] sm:$0xff]  ;;  %s179_s6 = smov [#allocation7]  }
  0x27   :  { %v67_v2 = vld [vmem:[#allocation5] sm:$0xff]  ;;  %v68_v3 = vld [vmem:[#allocation5 + $0x8] sm:$0xff]  ;;  %s83_s7 = sshll.u32 %s179_s6, 4  ;;  %s84_s7 = int_to_ptr.vmem [resolvable:$true] %s83_s7 }
  0x28   :  { %v69_v4 = vsub.f32 %v65_v0, %v67_v2  ;;  %v70_v5 = vsub.f32 %v66_v1, %v68_v3  ;;  %s147_s8 = scalar_lea.vmem %s84_s7, 128  ;;  %p152_p3 = scmp.lt.s32.totalorder %s84_s7, %s84_s7 }
  0x29   :  { %p148_p2 = scmp.ne.s32.totalorder %s84_s7, %s147_s8  ;;  %p153_p4 = scmp.lt.s32.totalorder %s147_s8, %s147_s8 }
  0x2a   :  { %v71_v6 = vmul.f32 %v69_v4, %v69_v4  ;;  %v72_v7 = vmul.f32 %v70_v5, %v70_v5 }
  0x2b   :  { %p154_p5 = por %p153_p4, %p152_p3 }
  0x2c   :  { %v74_v8 = vadd.f32 %v72_v7, %v71_v6 }
  0x2d   :  { %p155_p6 = pnand %p154_p5, %p148_p2 }
  0x2e   :  { %76 = vst [vmem:[#allocation7] sm:$0xff] %v74_v8 }
  0x2f   :  { %158 = shalt.err (!%p155_p6)
}
  0x30   :  { %s159_s10 = scalar_lea.hbm %s233_s2, 128 }
  0x31   :  { %p160_p7 = scmp.ne.s32.totalorder %s233_s2, %s159_s10  ;;  %p163_p8 = scmp.lt.u32.totalorder %s159_s10, %s233_s2 }
  0x33   :  { %p165_p9 = pnand %p163_p8, %p160_p7 }
  0x35   :  { %168 = shalt.err (!%p165_p9)
}
  0x36   :  { %86 = dma.vmem_to_hbm [thread:$0]  %s84_s7, 128, %s233_s2, [#allocation4]  }
  0x37   :  { %173 = dma.done.wait [#allocation4], 128  }
  0x38   :  { %174 = vsyncadd [#allocation4], 4294967168 }
  0x39   :  { %90 = vsyncpa [#allocation3], 1 }
  0x3a   :  { %91 = vsyncpa [#allocation6], 1 }
  0x3b   :  { %92 = vsyncpa [#allocation4], 1 }

</bundles_post_ra>
